<compile_context>
chip_gen: v7x
topology: tpu7x:2x2x1
jax: 0.10.0
libtpu: 0.0.40
codegen_flags: <defaults>
</compile_context>

<pallas_src>
import functools

import jax
import jax.numpy as jnp
from jax.experimental import pallas as pl
from jax.experimental.pallas import tpu as pltpu


# ----------------------------- device queries ------------------------------

def _device_kind():
    try:
        return jax.devices()[0].device_kind.lower()
    except Exception:
        return ""


def _bf16_vpu_ok():
    """bf16-native VPU/XLU: v6e and v7x.  Not v5e (or older)."""
    kind = _device_kind()
    return ("v6" in kind) or ("v7" in kind) or ("7x" in kind)


def _num_tensorcores():
    """TensorCores per device: 2 on v7x (megacore grid split), else 1."""
    kind = _device_kind()
    return 2 if (("v7" in kind) or ("7x" in kind)) else 1


def _vmem_capacity_bytes():
    try:
        info = pltpu.get_tpu_info()
        cap = getattr(info, "vmem_capacity_bytes", None)
        if cap:
            return int(cap)
    except Exception:
        pass
    return 64 << 20   # conservative default (v7x per-TensorCore VMEM)


# ------------------------------ kernel body ---------------------------------

def _div_mod_iota(lane, d, m):
    """(lane // d) % m, using shifts / ands when d, m are powers of two."""
    if d == 1:
        q = lane
    elif d & (d - 1) == 0:
        q = lane >> (d.bit_length() - 1)
    else:
        q = lane // d
    if m & (m - 1) == 0:
        return q & (m - 1)
    return q % m


def _window_sums(v, stride, k, lb):
    """s[f] = sum_{d=0..k-1} v[f + d*stride], via log2-depth doubling.

    Only block-start positions are ever selected downstream, and lane tiles
    are exact multiples of k*W, so the windows actually used never cross a
    tile edge (circular roll wrap never contaminates selected values).
    """
    if k == 1:
        return v
    pow_sums = {1: v}
    w, cur = 1, v
    while 2 * w <= k:
        cur = cur + pltpu.roll(cur, shift=(-(w * stride)) % lb, axis=1)
        w *= 2
        pow_sums[w] = cur
    bits = [1 << i for i in range(k.bit_length()) if k & (1 << i)]
    bits.sort(reverse=True)
    acc, covered = pow_sums[bits[0]], bits[0]
    for b in bits[1:]:
        acc = acc + pltpu.roll(pow_sums[b],
                               shift=(-(covered * stride)) % lb, axis=1)
        covered += b
    return acc


def _align_to_block_start(s, stride, residue, k, lb):
    """out[f] = s[f - residue[f]*stride] via binary (log2-depth) alignment.

    residue: (1, lb) int32 row with values in [0, k); broadcast over sublanes.
    """
    if k == 1:
        return s
    out = s
    b = 1
    while b < k:
        mask = (residue & b) != 0                      # (1, lb) row
        rolled = pltpu.roll(out, shift=(b * stride) % lb, axis=1)
        out = jnp.where(mask, rolled, out)
        b *= 2
    return out


def _hfm_kernel(x_ref, o_ref, *, k, W, compute_dtype):
    """x_ref / o_ref: (rb, lb) tiles of the (B*C, H*W) slab."""
    x = x_ref[...].astype(compute_dtype)
    lb = x.shape[1]

    # Row-shaped residues: each lane's position inside its k-block along the
    # flattened-W axis (stride 1) and along the H axis (stride W).
    lane = jax.lax.broadcasted_iota(jnp.int32, (1, lb), 1)
    j_res = _div_mod_iota(lane, 1, k)
    i_res = _div_mod_iota(lane, W, k)

    s_w = _align_to_block_start(_window_sums(x, 1, k, lb), 1, j_res, k, lb)
    s_hw = _align_to_block_start(_window_sums(s_w, W, k, lb), W, i_res, k, lb)
    pooled = s_hw * jnp.asarray(1.0 / (k * k), dtype=compute_dtype)

    o_ref[...] = (x - pooled).astype(o_ref.dtype)


# ------------------------------ tile selection ------------------------------

def _n_temp_tiles(k):
    # x + window-sum partials + aligned sums + pooled (all full-tile,
    # compute dtype); grows slowly with log2(k).
    return 6 + max(0, k.bit_length() - 2)


def _footprint_bytes(rb, lb, in_itemsize, compute_itemsize, k):
    io = 2 * 2 * rb * lb * in_itemsize                  # double-buffered in+out
    tmp = _n_temp_tiles(k) * rb * lb * compute_itemsize  # in-kernel temporaries
    return io + tmp + 2 * 4 * lb                        # + two (1, lb) i32 rows


def _pick_tiles(BC, H, W, k, in_itemsize, compute_itemsize,
                target_block_bytes, vmem_budget_bytes, prefer_multi_step):
    """Choose (row_tile, lane_tile) for the (B*C, H*W) slab.

    Lane tiles span whole multiples of k image rows (so k x k pooling blocks
    never straddle a tile edge); tier-1 candidates are also multiples of 128
    lanes (lane-dense stores).  Row tiles are multiples of the dtype's sublane
    packing, or the full B*C extent.
    """
    HW = H * W
    sublane = max(8, 32 // in_itemsize)            # 8 f32, 16 bf16, 32 int8

    lane_dense, lane_any = {HW}, {HW}
    for hb in range(k, H, k):
        if H % hb == 0:
            lane_any.add(hb * W)
            if (hb * W) % 128 == 0:
                lane_dense.add(hb * W)

    row_opts = {BC}
    for rb in range(sublane, BC, sublane):
        if BC % rb == 0:
            row_opts.add(rb)

    fp = lambda c: _footprint_bytes(c[0], c[1], in_itemsize, compute_itemsize, k)
    blk = lambda c: c[0] * c[1] * in_itemsize
    steps = lambda c: (BC // c[0]) * (HW // c[1])

    def choose(lane_opts):
        cands = [(rb, lb) for rb in row_opts for lb in lane_opts]
        fits = [c for c in cands if fp(c) <= vmem_budget_bytes]
        if not fits:
            return None
        pool = [c for c in fits if blk(c) <= target_block_bytes] or fits
        if prefer_multi_step:
            multi = [c for c in pool if steps(c) >= 2]
            if multi:
                pool = [c for c in multi if steps(c) % 2 == 0] or multi
        return max(pool, key=blk)

    best = choose(lane_dense)
    if best is None:
        # VMEM-fit fallback: a non-128-multiple lane tile (masked stores) beats
        # exceeding the scoped VMEM limit.
        best = choose(lane_any)
    if best is None:
        # TODO(synk): remainder-step tiling for awkward H; for now take the
        # smallest-footprint candidate and rely on the raised scoped limit.
        cands = [(rb, lb) for rb in row_opts for lb in lane_any]
        best = min(cands, key=fp)
    return best


# ------------------------------ public wrapper -------------------------------

def hfm_forward(x: jnp.ndarray, k: int = 2, *, target_block_bytes: int = 4 << 20):
    """x: (B, C, H, W), NCHW (matching the PyTorch module)."""
    B, C, H, W = x.shape
    assert H % k == 0 and W % k == 0, "h, w must divisible by k"
    BC, HW = B * C, H * W
    itemsize = x.dtype.itemsize

    # bf16 internal math only where the VPU/XLU are bf16-native (v6e / v7x)
    # and the summand count stays small; otherwise accumulate in f32.
    if x.dtype == jnp.bfloat16 and k <= 4 and _bf16_vpu_ok():
        compute_dtype = jnp.bfloat16
    else:
        compute_dtype = jnp.float32
    compute_itemsize = jnp.dtype(compute_dtype).itemsize

    capacity = _vmem_capacity_bytes()
    vmem_budget = (capacity * 3) // 4           # leave compiler headroom
    prefer_multi_step = _num_tensorcores() >= 2

    rb, lb = _pick_tiles(BC, H, W, k, itemsize, compute_itemsize,
                         target_block_bytes, vmem_budget, prefer_multi_step)
    grid = (BC // rb, HW // lb)

    footprint = _footprint_bytes(rb, lb, itemsize, compute_itemsize, k)
    vmem_limit = max(32 << 20, (footprint * 5) // 4)
    vmem_limit = min(vmem_limit, max(capacity - (8 << 20), 16 << 20))

    x2 = x.reshape(BC, HW)                      # free reshape: 1 image per row
    out2 = pl.pallas_call(
        functools.partial(_hfm_kernel, k=k, W=W, compute_dtype=compute_dtype),
        out_shape=jax.ShapeDtypeStruct((BC, HW), x.dtype),
        grid_spec=pltpu.PrefetchScalarGridSpec(
            num_scalar_prefetch=0,
            grid=grid,
            in_specs=[pl.BlockSpec((rb, lb), lambda i, j: (i, j))],
            out_specs=pl.BlockSpec((rb, lb), lambda i, j: (i, j)),
        ),
        compiler_params=pltpu.CompilerParams(
            dimension_semantics=("parallel", "parallel"),
            vmem_limit_bytes=int(vmem_limit)),
        cost_estimate=pl.CostEstimate(
            flops=BC * HW * (2 * k + 2),
            transcendentals=0,
            bytes_accessed=2 * BC * HW * itemsize),
    )(x2)

    return out2.reshape(B, C, H, W)


def _hfm_reference(x: jnp.ndarray, k: int = 2) -> jnp.ndarray:
    """Pure-JAX reference of AvgPool2d(k) + Upsample(nearest, k)."""
    B, C, H, W = x.shape
    pooled = x.reshape(B, C, H // k, k, W // k, k).mean(axis=(3, 5))
    up = jnp.repeat(jnp.repeat(pooled, k, axis=2), k, axis=3)
    return x - up


if __name__ == "__main__":
    key = jax.random.PRNGKey(0)

    # 1) Module-default config: f32, k=2, (B, C, H, W) = (2, 4, 16, 16).
    x = jax.random.normal(key, (2, 4, 16, 16), dtype=jnp.float32)
    out = jax.block_until_ready(hfm_forward(x, k=2))
    ref = _hfm_reference(x, k=2)
    assert out.shape == x.shape
    assert jnp.allclose(out, ref, atol=1e-5, rtol=1e-5), "f32 k=2 mismatch"

    # 2) Force row- and lane-tiling (multi-step grid) with a tiny block budget.
    x2 = jax.random.normal(jax.random.PRNGKey(1), (2, 8, 16, 16), jnp.float32)
    out2 = jax.block_until_ready(hfm_forward(x2, k=2, target_block_bytes=4096))
    assert jnp.allclose(out2, _hfm_reference(x2, k=2), atol=1e-5, rtol=1e-5), \
        "tiled f32 k=2 mismatch"

    # 3) General k path (k=4), exercising log2-depth sums/alignment.
    out3 = jax.block_until_ready(hfm_forward(x, k=4))
    assert jnp.allclose(out3, _hfm_reference(x, k=4), atol=1e-5, rtol=1e-5), \
        "f32 k=4 mismatch"

    # 4) bf16 input: bf16 internal math on v6e/v7x, f32 upcast elsewhere.
    xb = x.astype(jnp.bfloat16)
    outb = jax.block_until_ready(hfm_forward(xb, k=2))
    refb = _hfm_reference(xb.astype(jnp.float32), k=2)
    assert jnp.allclose(outb.astype(jnp.float32), refb, atol=3e-2, rtol=2e-2), \
        "bf16 k=2 mismatch"

    print("KERNEL_OK")
</pallas_src>

<mosaic_0001>
module attributes {stable_mosaic.version = 11 : i64} {
  func.func @_hfm_kernel(%arg0: i32, %arg1: i32, %arg2: memref<8x256xf32, #tpu.memory_space<vmem>>, %arg3: memref<8x256xf32, #tpu.memory_space<vmem>>) attributes {dimension_semantics = [#tpu.dimension_semantics<parallel>, #tpu.dimension_semantics<parallel>], iteration_bounds = array<i64: 1, 1>, scalar_prefetch = 0 : i64, scratch_operands = 0 : i64, tpu.core_type = #tpu.core_type<tc>, window_params = [{transform_indices = @transform_0, window_bounds = array<i64: 8, 256>}, {transform_indices = @transform_1, window_bounds = array<i64: 8, 256>}]} {
    %c0 = arith.constant 0 : index
    %c0_0 = arith.constant 0 : index
    %0 = vector.load %arg2[%c0, %c0_0] : memref<8x256xf32, #tpu.memory_space<vmem>>, vector<8x256xf32>
    %1 = tpu.iota {dimensions = array<i32: 1>} : vector<1x256xi32>
    %c1_i32 = arith.constant 1 : i32
    %2 = vector.broadcast %c1_i32 : i32 to vector<1x256xi32>
    %3 = arith.andi %1, %2 : vector<1x256xi32>
    %c4_i32 = arith.constant 4 : i32
    %4 = vector.broadcast %c4_i32 : i32 to vector<1x256xi32>
    %5 = arith.shrsi %1, %4 : vector<1x256xi32>
    %c1_i32_1 = arith.constant 1 : i32
    %6 = vector.broadcast %c1_i32_1 : i32 to vector<1x256xi32>
    %7 = arith.andi %5, %6 : vector<1x256xi32>
    %c255_i32 = arith.constant 255 : i32
    %8 = tpu.dynamic_rotate %0 by %c255_i32 dim 1 : vector<8x256xf32>, i32 -> vector<8x256xf32>
    %9 = arith.addf %0, %8 : vector<8x256xf32>
    %c1_i32_2 = arith.constant 1 : i32
    %10 = vector.broadcast %c1_i32_2 : i32 to vector<1x256xi32>
    %11 = arith.andi %3, %10 : vector<1x256xi32>
    %c0_i32 = arith.constant 0 : i32
    %12 = vector.broadcast %c0_i32 : i32 to vector<1x256xi32>
    %13 = arith.cmpi ne, %11, %12 : vector<1x256xi32>
    %c1_i32_3 = arith.constant 1 : i32
    %14 = tpu.dynamic_rotate %9 by %c1_i32_3 dim 1 : vector<8x256xf32>, i32 -> vector<8x256xf32>
    %15 = vector.shape_cast %13 : vector<1x256xi1> to vector<1x256xi1>
    %16 = vector.broadcast %15 : vector<1x256xi1> to vector<8x256xi1>
    %17 = arith.select %16, %14, %9 : vector<8x256xi1>, vector<8x256xf32>
    %c240_i32 = arith.constant 240 : i32
    %18 = tpu.dynamic_rotate %17 by %c240_i32 dim 1 : vector<8x256xf32>, i32 -> vector<8x256xf32>
    %19 = arith.addf %17, %18 : vector<8x256xf32>
    %c1_i32_4 = arith.constant 1 : i32
    %20 = vector.broadcast %c1_i32_4 : i32 to vector<1x256xi32>
    %21 = arith.andi %7, %20 : vector<1x256xi32>
    %c0_i32_5 = arith.constant 0 : i32
    %22 = vector.broadcast %c0_i32_5 : i32 to vector<1x256xi32>
    %23 = arith.cmpi ne, %21, %22 : vector<1x256xi32>
    %c16_i32 = arith.constant 16 : i32
    %24 = tpu.dynamic_rotate %19 by %c16_i32 dim 1 : vector<8x256xf32>, i32 -> vector<8x256xf32>
    %25 = vector.shape_cast %23 : vector<1x256xi1> to vector<1x256xi1>
    %26 = vector.broadcast %25 : vector<1x256xi1> to vector<8x256xi1>
    %27 = arith.select %26, %24, %19 : vector<8x256xi1>, vector<8x256xf32>
    %cst = arith.constant 2.500000e-01 : f32
    %28 = vector.broadcast %cst : f32 to vector<8x256xf32>
    %29 = arith.mulf %27, %28 : vector<8x256xf32>
    %30 = arith.subf %0, %29 : vector<8x256xf32>
    %c0_6 = arith.constant 0 : index
    %c0_7 = arith.constant 0 : index
    %31 = vector.load %arg3[%c0_6, %c0_7] : memref<8x256xf32, #tpu.memory_space<vmem>>, vector<8x256xf32>
    tpu.vector_store %arg3[%c0_6, %c0_7], %30 {strides = array<i32>} : memref<8x256xf32, #tpu.memory_space<vmem>>, vector<8x256xf32>,
    return
  }
  func.func @transform_0(%arg0: i32, %arg1: i32) -> (i32, i32) {
    %c0_i32 = arith.constant 0 : i32
    return %arg0, %arg1 : i32, i32
  }
  func.func @transform_1(%arg0: i32, %arg1: i32) -> (i32, i32) {
    %c0_i32 = arith.constant 0 : i32
    return %arg0, %arg1 : i32, i32
  }
}

</mosaic_0001>

<bundles_post_ra>
// kernel: tpu_custom_call.1
= control target key start
LH: loop header
LB: loop body
LE: loop exit
PB: predicated region body
PF: predicated region fallthrough
CT: control target
= control target key end

     0   :  { %6 = vsyncpa [#allocation3], 0  ;;  %s195_s0 = inlined_call_operand.hbm [shape: f32[8,256], index: 0, kind: input, shape index: {}]   ;;  %s196_s1 = inlined_call_operand.hbm [shape: f32[8,256], index: 1, kind: output, shape index: {}]  }
   0x1   :  { %7 = vsyncpa [#allocation4], 0  ;;  %s155_s6 = smov [#allocation2]   ;;  %s107_s10 = scalar_lea.hbm %s195_s0, 256 }
   0x2   :  { %s14_s7 = sshll.u32 %s155_s6, 4  ;;  %p108_p0 = scmp.ne.s32.totalorder %s195_s0, %s107_s10  ;;  %s15_s7 = int_to_ptr.vmem [resolvable:$true] %s14_s7 }
   0x3   :  { %p111_p1 = scmp.lt.u32.totalorder %s107_s10, %s195_s0 }
   0x5   :  { %p113_p2 = pnand %p111_p1, %p108_p0 }
   0x7   :  { %116 = shalt.err (!%p113_p2)
}
   0x8   :  { %s117_s15 = scalar_lea.vmem %s15_s7, 256  ;;  %p122_p4 = scmp.lt.s32.totalorder %s15_s7, %s15_s7 }
   0x9   :  { %p118_p3 = scmp.ne.s32.totalorder %s15_s7, %s117_s15  ;;  %p123_p5 = scmp.lt.s32.totalorder %s117_s15, %s117_s15 }
   0xb   :  { %p124_p6 = por %p123_p5, %p122_p4 }
   0xd   :  { %p125_p7 = pnand %p124_p6, %p118_p3 }
   0xf   :  { %128 = shalt.err (!%p125_p7)
}
  0x10   :  { %17 = dma.hbm_to_vmem [thread:$0]  %s195_s0, 256, %s15_s7, [#allocation3]  }
  0x11   :  { %151 = dma.done.wait [#allocation3], 256  }
  0x12   :  { %152 = vsyncadd [#allocation3], 4294967040  ;;  %v21_v0 = vld [vmem:[#allocation2] sm:$0xff]  ;;  %s156_s18 = smov 127   ;;  %v22_v1 = vld [vmem:[#allocation2 + $0x8] sm:$0xff]  ;;  %v23_v2 = vlaneseq  ;;  %s157_s19 = smov 1  }
  0x13   :  { %32 = vrot.lane.b32.xlu0 %v21_v0, %s156_s18  ;;  %s158_s0 = smov 112   ;;  %s159_s20 = smov 16  }
  0x14   :  { %v24_v3 = vand.u32 127, %v23_v2  ;;  %s160_s21 = smov [#allocation5]  }
  0x15   :  { %s92_s22 = sshll.u32 %s160_s21, 4  ;;  %s93_s22 = int_to_ptr.vmem [resolvable:$true] %s92_s22 }
  0x16   :  { %vm36_vm0 = vcmp.lt.s32.totalorder %v24_v3, 127  ;;  %v25_v10 = vadd.s32 128, %v24_v3  ;;  %v26_v11 = vand.u32 1, %v24_v3  ;;  %vm47_vm1 = vcmp.lt.s32.totalorder %v24_v3, 1  ;;  %s129_s23 = scalar_lea.vmem %s93_s22, 256  ;;  %p134_p9 = scmp.lt.s32.totalorder %s93_s22, %s93_s22 }
  0x17   :  { %34 = vrot.lane.b32.xlu0 %v22_v1, %s156_s18  ;;  %vm60_vm4 = vcmp.lt.s32.totalorder %v24_v3, 112  ;;  %v28_v25 = vshra.s32 %v24_v3, 4  ;;  %vm71_vm5 = vcmp.lt.s32.totalorder %v24_v3, 16  ;;  %p130_p8 = scmp.ne.s32.totalorder %s93_s22, %s129_s23  ;;  %p135_p10 = scmp.lt.s32.totalorder %s129_s23, %s129_s23 }
  0x18   :  { %v27_v12 = vand.u32 1, %v25_v10  ;;  %vm41_vm2 = vcmp.ne.s32.totalorder %v26_v11, 0  ;;  %v29_v26 = vshra.s32 %v25_v10, 4 }
  0x19   :  { %v30_v27 = vand.u32 1, %v28_v25  ;;  %p136_p11 = por %p135_p10, %p134_p9 }
  0x1a   :  { %vm42_vm3 = vcmp.ne.s32.totalorder %v27_v12, 0  ;;  %v31_v28 = vand.u32 1, %v29_v26 }
  0x1b   :  { %vm65_vm6 = vcmp.ne.s32.totalorder %v30_v27, 0  ;;  %p137_p12 = pnand %p136_p11, %p130_p8 }
  0x1c   :  { %vm66_vm7 = vcmp.ne.s32.totalorder %v31_v28, 0 }
  0x85   :  { %v33_v4 = vpop.permute.xlu0 %32 }
  0x89   :  { %v35_v5 = vpop.permute.xlu0 %34 }
  0x8a   :  { %v37_v6 = vsel %vm36_vm0, %v33_v4, %v35_v5  ;;  %v38_v8 = vsel %vm36_vm0, %v35_v5, %v33_v4 }
  0x8b   :  { %v39_v7 = vadd.f32 %v37_v6, %v21_v0  ;;  %v40_v9 = vadd.f32 %v38_v8, %v22_v1 }
  0x8d   :  { %43 = vrot.lane.b32.xlu1 %v39_v7, %s157_s19 }
  0x91   :  { %45 = vrot.lane.b32.xlu1 %v40_v9, %s157_s19 }
  0xff   :  { %v44_v13 = vpop.permute.xlu1 %43 }
 0x103   :  { %v46_v14 = vpop.permute.xlu1 %45 }
 0x104   :  { %v48_v15 = vsel %vm47_vm1, %v44_v13, %v46_v14  ;;  %v49_v16 = vsel %vm47_vm1, %v46_v14, %v44_v13 }
 0x105   :  { %v54_v17 = vsel %vm41_vm2, %v49_v16, %v39_v7  ;;  %v55_v18 = vsel %vm42_vm3, %v48_v15, %v40_v9 }
 0x106   :  { %56 = vrot.lane.b32.xlu0 %v54_v17, %s158_s0  ;;  %58 = vrot.lane.b32.xlu1 %v55_v18, %s158_s0 }
 0x178   :  { %v57_v19 = vpop.permute.xlu0 %56  ;;  %v59_v20 = vpop.permute.xlu1 %58 }
 0x179   :  { %v61_v21 = vsel %vm60_vm4, %v57_v19, %v59_v20  ;;  %v62_v22 = vsel %vm60_vm4, %v59_v20, %v57_v19 }
 0x17a   :  { %v63_v23 = vadd.f32 %v61_v21, %v54_v17  ;;  %v64_v24 = vadd.f32 %v62_v22, %v55_v18 }
 0x17c   :  { %69 = vrot.lane.b32.xlu1 %v64_v24, %s159_s20  ;;  %67 = vrot.lane.b32.xlu0 %v63_v23, %s159_s20 }
 0x1ee   :  { %v70_v29 = vpop.permute.xlu1 %69  ;;  %v68_v30 = vpop.permute.xlu0 %67 }
 0x1ef   :  { %v72_v31 = vsel %vm71_vm5, %v68_v30, %v70_v29  ;;  %v73_v32 = vsel %vm71_vm5, %v70_v29, %v68_v30 }
 0x1f0   :  { %v78_v33 = vsel %vm65_vm6, %v73_v32, %v63_v23  ;;  %v79_v34 = vsel %vm66_vm7, %v72_v31, %v64_v24 }
 0x1f1   :  { %v80_v35 = vmul.f32 0.25, %v78_v33  ;;  %v81_v36 = vmul.f32 0.25, %v79_v34 }
 0x1f3   :  { %v82_v37 = vsub.f32 %v21_v0, %v80_v35  ;;  %v83_v38 = vsub.f32 %v22_v1, %v81_v36 }
 0x1f5   :  { %84 = vst [vmem:[#allocation5] sm:$0xff] %v82_v37  ;;  %85 = vst [vmem:[#allocation5 + $0x8] sm:$0xff] %v83_v38 }
 0x1f6   :  { %140 = shalt.err (!%p137_p12)
}
 0x1f7   :  { %s141_s26 = scalar_lea.hbm %s196_s1, 256 }
 0x1f8   :  { %p142_p13 = scmp.ne.s32.totalorder %s196_s1, %s141_s26  ;;  %p145_p0 = scmp.lt.u32.totalorder %s141_s26, %s196_s1 }
 0x1fa   :  { %p147_p1 = pnand %p145_p0, %p142_p13 }
 0x1fc   :  { %150 = shalt.err (!%p147_p1)
}
 0x1fd   :  { %95 = dma.vmem_to_hbm [thread:$0]  %s93_s22, 256, %s196_s1, [#allocation4]  }
 0x1fe   :  { %153 = dma.done.wait [#allocation4], 256  }
 0x1ff   :  { %154 = vsyncadd [#allocation4], 4294967040 }
 0x200   :  { %99 = vsyncpa [#allocation3], 1 }
 0x201   :  { %100 = vsyncpa [#allocation4], 1 }

</bundles_post_ra>
